<compile_context>
chip_gen: v7x
topology: tpu7x:2x2x1
jax: 0.10.0
libtpu: 0.0.40
codegen_flags: <defaults>
</compile_context>

<pallas_src>
import functools

import jax
import jax.numpy as jnp
from jax import lax
from jax.experimental import pallas as pl
from jax.experimental.pallas import tpu as pltpu

IMAGENET_MEAN = (0.485, 0.456, 0.406)
IMAGENET_STD = (0.229, 0.224, 0.225)
LAYER_STRIDES = (4, 8, 16)  # resnet18 layer1/2/3 downsampling factors


def _round_up(n, m):
    return -(-n // m) * m


# ----------------------------- Pallas kernels -----------------------------

def _normalize_kernel(x_ref, mean_ref, isd_ref, o_ref):
    # x_ref: (B*C, ct) lane-dense tile; mean/isd: (B*C, 1) broadcast along lanes.
    o_ref[...] = (x_ref[...] - mean_ref[...]) * isd_ref[...]


def normalize(x):
    """(x - mean_c) * (1/std_c) in NCHW; lane-tiled so it pipelines."""
    B, C, H, W = x.shape
    R, L = B * C, H * W
    mean = jnp.asarray(IMAGENET_MEAN, jnp.float32)
    inv_std = 1.0 / jnp.asarray(IMAGENET_STD, jnp.float32)
    x2 = x.reshape(R, L).astype(jnp.float32)
    mean_col = jnp.tile(mean, B).reshape(R, 1)
    isd_col = jnp.tile(inv_std, B).reshape(R, 1)

    # Column tile: largest 128-multiple divisor of L (caps VMEM, keeps lanes
    # dense).  Ragged / tiny images fall back to a single full-width block.
    if L % 128 == 0:
        ct = 128
        for cand in (8192, 4096, 2048, 1024, 512, 256, 128):
            if cand <= L and L % cand == 0:
                ct = cand
                break
    else:
        ct = L
    n_col = pl.cdiv(L, ct)

    out = pl.pallas_call(
        _normalize_kernel,
        out_shape=jax.ShapeDtypeStruct((R, L), jnp.float32),
        grid=(n_col,),
        in_specs=[
            pl.BlockSpec((R, ct), lambda j: (0, j)),
            pl.BlockSpec((R, 1), lambda j: (0, 0)),
            pl.BlockSpec((R, 1), lambda j: (0, 0)),
        ],
        out_specs=pl.BlockSpec((R, ct), lambda j: (0, j)),
        compiler_params=pltpu.CompilerParams(dimension_semantics=("parallel",)),
    )(x2, mean_col, isd_col)
    return out.reshape(B, C, H, W)


def _descriptor_distance_kernel(x_ref, w_ref, b_ref, m2_ref, c2_ref, o_ref):
    # Fused Descriptor projection + compute_distance; intermediate y stays on chip.
    #   x_ref : (tm, Cin_p)   bf16    w_ref : (Cin_p, Cout_p) bf16
    #   b_ref : (1, Cout_p)   f32     m2_ref: (Cout_p, Kp)    bf16  (= 2 * memory_bank)
    #   c2_ref: (1, Kp)       f32     o_ref : (tm, Kp)        f32
    y = jnp.dot(x_ref[...], w_ref[...],
                preferred_element_type=jnp.float32) + b_ref[...]
    f2 = jnp.sum(y * y, axis=1, keepdims=True)                       # (tm, 1)
    fc2 = jnp.dot(y.astype(jnp.bfloat16), m2_ref[...],
                  preferred_element_type=jnp.float32)                # (tm, Kp)
    o_ref[...] = f2 + c2_ref[...] - fc2


def _descriptor_score_kernel(x_ref, w_ref, b_ref, m2_ref, c2_ref, o_ref, *, k_nn):
    # Eval variant: same fused distance, plus sqrt + k-smallest + softmin score
    # reduction in the epilogue.  Output is (tm, 1); the full (tm, Kp) distance
    # never leaves the chip.  Padded K columns carry c2 ~= 1e30 so they never
    # win the k-smallest selection.
    y = jnp.dot(x_ref[...], w_ref[...],
                preferred_element_type=jnp.float32) + b_ref[...]
    f2 = jnp.sum(y * y, axis=1, keepdims=True)
    fc2 = jnp.dot(y.astype(jnp.bfloat16), m2_ref[...],
                  preferred_element_type=jnp.float32)
    dist = jnp.maximum(f2 + c2_ref[...] - fc2, 0.0)
    d = jnp.sqrt(dist)

    lane = lax.broadcasted_iota(jnp.int32, d.shape, 1)
    big_f = jnp.float32(3.0e38)
    big_i = jnp.int32(2 ** 30)
    mins = []
    dd = d
    for _ in range(k_nn):  # static small loop: iterative first-occurrence min
        m = jnp.min(dd, axis=1, keepdims=True)
        mins.append(m)
        is_min = dd == m
        first = jnp.min(jnp.where(is_min, lane, big_i), axis=1, keepdims=True)
        dd = jnp.where(lane == first, big_f, dd)

    # softmin(d_topk)[0] * d_topk[0] == d0 / (1 + sum_j exp(d0 - d_j)), d0 <= d_j
    d0 = mins[0]
    denom = jnp.ones_like(d0)
    for m in mins[1:]:
        denom = denom + jnp.exp(d0 - m)
    o_ref[...] = d0 / denom


def _pick_tile_m(M, Cin_p, Cout_p, Kp):
    """Largest row tile (128..512) fitting a conservative ~20 MiB VMEM budget
    (safe against the v5e 16 MiB / v6e-v7x 32 MiB scoped defaults)."""
    budget = 20 * 1024 * 1024
    fixed = 2 * (Cin_p * Cout_p * 2 + Cout_p * Kp * 2 + Kp * 4 + Cout_p * 4)
    row_cap = max(128, _round_up(M, 128))
    for tm in (512, 256, 128):
        if tm > row_cap:
            continue
        need = fixed + 2 * tm * (Cin_p * 2 + Kp * 4) + tm * (Cout_p + Kp) * 4
        if need <= budget:
            return tm
    return 128


def _prep_descriptor_operands(xflat, desc_w, desc_b, memory_bank, eval_mode):
    """Pad/cast operands once on the host side: bf16 x rows, Cin/Cout/K padded
    to multiples of 128, ||c||^2 hoisted, 2x folded into the bank."""
    B, HW, Cin = xflat.shape
    Cout, K = memory_bank.shape
    M = B * HW
    Cin_p = _round_up(Cin, 128)
    Cout_p = _round_up(Cout, 128)
    Kp = _round_up(K, 128)
    tile_m = _pick_tile_m(M, Cin_p, Cout_p, Kp)
    M_pad = _round_up(M, tile_m)

    x_rows = xflat.reshape(M, Cin).astype(jnp.bfloat16)
    if M_pad != M or Cin_p != Cin:
        x_rows = jnp.pad(x_rows, ((0, M_pad - M), (0, Cin_p - Cin)))
    w_p = jnp.pad(desc_w.astype(jnp.bfloat16),
                  ((0, Cin_p - Cin), (0, Cout_p - Cout)))
    b_p = jnp.pad(desc_b.reshape(1, Cout).astype(jnp.float32),
                  ((0, 0), (0, Cout_p - Cout)))
    mb = jnp.pad(memory_bank.astype(jnp.float32),
                 ((0, Cout_p - Cout), (0, Kp - K)))
    c2 = jnp.sum(mb * mb, axis=0, keepdims=True)             # (1, Kp), hoisted
    if eval_mode and Kp != K:
        # Padded bank columns would have distance = ||y||^2 (spuriously small);
        # push them out of k-smallest range.
        c2 = jnp.where(jnp.arange(Kp)[None, :] < K, c2, jnp.float32(1e30))
    m2 = (2.0 * mb).astype(jnp.bfloat16)                     # fold 2x into bank

    dims = (B, HW, K, M, M_pad, Cin_p, Cout_p, Kp, tile_m)
    return x_rows, w_p, b_p, m2, c2, dims


def _descriptor_specs(tile_m, Cin_p, Cout_p, Kp):
    return [
        pl.BlockSpec((tile_m, Cin_p), lambda i: (i, 0)),
        pl.BlockSpec((Cin_p, Cout_p), lambda i: (0, 0)),
        pl.BlockSpec((1, Cout_p), lambda i: (0, 0)),
        pl.BlockSpec((Cout_p, Kp), lambda i: (0, 0)),
        pl.BlockSpec((1, Kp), lambda i: (0, 0)),
    ]


def descriptor_distance(xflat, desc_w, desc_b, memory_bank):
    """Training path: fused projection + full distance matrix (B, HW, K)."""
    x_rows, w_p, b_p, m2, c2, dims = _prep_descriptor_operands(
        xflat, desc_w, desc_b, memory_bank, eval_mode=False)
    B, HW, K, M, M_pad, Cin_p, Cout_p, Kp, tile_m = dims

    out = pl.pallas_call(
        _descriptor_distance_kernel,
        out_shape=jax.ShapeDtypeStruct((M_pad, Kp), jnp.float32),
        grid=(M_pad // tile_m,),
        in_specs=_descriptor_specs(tile_m, Cin_p, Cout_p, Kp),
        out_specs=pl.BlockSpec((tile_m, Kp), lambda i: (i, 0)),
        compiler_params=pltpu.CompilerParams(
            dimension_semantics=("parallel",)),
    )(x_rows, w_p, b_p, m2, c2)

    if M_pad != M or Kp != K:        # skip the copy when already aligned
        out = out[:M, :K]
    return out.reshape(B, HW, K)


def descriptor_scores(xflat, desc_w, desc_b, memory_bank, num_nearest_neighbors):
    """Eval path: fused projection + distance + kNN/softmin score (B, HW)."""
    x_rows, w_p, b_p, m2, c2, dims = _prep_descriptor_operands(
        xflat, desc_w, desc_b, memory_bank, eval_mode=True)
    B, HW, K, M, M_pad, Cin_p, Cout_p, Kp, tile_m = dims

    kernel = functools.partial(_descriptor_score_kernel,
                               k_nn=num_nearest_neighbors)
    score = pl.pallas_call(
        kernel,
        out_shape=jax.ShapeDtypeStruct((M_pad, 1), jnp.float32),
        grid=(M_pad // tile_m,),
        in_specs=_descriptor_specs(tile_m, Cin_p, Cout_p, Kp),
        out_specs=pl.BlockSpec((tile_m, 1), lambda i: (i, 0)),
        compiler_params=pltpu.CompilerParams(
            dimension_semantics=("parallel",)),
    )(x_rows, w_p, b_p, m2, c2)

    if M_pad != M:
        score = score[:M]
    return score.reshape(B, HW)


# ------------------------------- JAX glue ----------------------------------

def _avg_pool_nchw(x, k, s, padding):
    out = lax.reduce_window(x, 0.0, lax.add, (1, 1, k, k), (1, 1, s, s), padding)
    return out / float(k * k)


def synthetic_backbone(x, mix_weights):
    # TODO(synk): pretrained resnet18 feature extractor has no Pallas
    # equivalent; replaced by deterministic strided-pool + 1x1 channel-mix
    # stand-in producing the same layer1/2/3 shapes (64/128/256 ch, /4 /8 /16).
    feats = []
    for stride, w in zip(LAYER_STRIDES, mix_weights):
        pooled = _avg_pool_nchw(x, stride, stride, "VALID")     # (B,3,H/s,W/s)
        feats.append(jnp.einsum("bchw,cd->bdhw", pooled, w))
    return feats


def descriptor_features(features):
    """CFA-style Descriptor front half: 3x3 avg-pool, bilinear upsample,
    concat, AddCoords.  Returns (B, HW, C+2) bf16 flat features."""
    sample = None
    for feat in features:
        pooled = _avg_pool_nchw(feat, 3, 1, "SAME")
        if sample is None:
            sample = pooled
        else:
            up = jax.image.resize(
                pooled,
                (pooled.shape[0], pooled.shape[1], sample.shape[2], sample.shape[3]),
                method="bilinear")
            sample = jnp.concatenate([sample, up], axis=1)

    B, C, H, W = sample.shape
    # AddCoords (rank-2): normalized coordinates in [-1, 1].
    xx = (jnp.arange(W, dtype=jnp.float32) / (W - 1)) * 2.0 - 1.0
    yy = (jnp.arange(H, dtype=jnp.float32) / (H - 1)) * 2.0 - 1.0
    xx_ch = jnp.broadcast_to(xx[None, None, None, :], (B, 1, H, W))
    yy_ch = jnp.broadcast_to(yy[None, None, :, None], (B, 1, H, W))
    sample = jnp.concatenate([sample, xx_ch, yy_ch], axis=1)    # (B, C+2, H, W)

    # bf16 cast BEFORE the layout change: halves transpose bytes and feeds the
    # MXU kernel directly (f32 accumulation happens in-kernel).
    sample = sample.astype(jnp.bfloat16)
    # NCHW -> (B, HW, C+2)  (same ordering as rearrange 'b c h w -> b (h w) c')
    xflat = jnp.transpose(sample, (0, 2, 3, 1)).reshape(B, H * W, C + 2)
    return xflat, (H, W)


def anomaly_map_from_scores(score, scale, image_size):
    """AnomalyMapGenerator tail: reshape score map, bilinear upsample."""
    B, HW = score.shape
    h, w = scale
    amap = score.reshape(B, 1, h, w)                            # (B, 1, h, w)
    amap = jax.image.resize(
        amap, (B, 1, image_size[0], image_size[1]), method="bilinear")
    # TODO(synk): GaussianBlur2d smoothing of the anomaly map is omitted.
    return amap


@functools.partial(jax.jit, static_argnames=("training", "num_nearest_neighbors"))
def adfa_forward(x, params, training=True, num_nearest_neighbors=3):
    x = normalize(x)
    feats = synthetic_backbone(x, params["backbone"])
    xflat, scale = descriptor_features(feats)
    if training:
        return descriptor_distance(
            xflat, params["desc_w"], params["desc_b"], params["memory_bank"])
    score = descriptor_scores(
        xflat, params["desc_w"], params["desc_b"], params["memory_bank"],
        num_nearest_neighbors)
    return anomaly_map_from_scores(score, scale, (x.shape[2], x.shape[3]))


# ------------------------------- main --------------------------------------

if __name__ == "__main__":
    key = jax.random.PRNGKey(0)
    k_x, k_b1, k_b2, k_b3, k_w, k_b, k_m = jax.random.split(key, 7)

    # Small shapes consistent with ADFA(backbone='resnet18', gamma_d=4).
    B, H, W = 2, 32, 32
    gamma_d = 4
    layer_channels = (64, 128, 256)      # resnet18 layer1/2/3
    concat_dim = sum(layer_channels)     # 448
    target_dim = concat_dim // gamma_d   # 112
    feat_h, feat_w = H // 4, W // 4      # first feature-map resolution (8, 8)
    n_memory = feat_h * feat_w           # memory bank columns (64)

    x = jax.random.uniform(k_x, (B, 3, H, W), jnp.float32)

    params = {
        "backbone": [
            0.1 * jax.random.normal(k_b1, (3, layer_channels[0]), jnp.float32),
            0.1 * jax.random.normal(k_b2, (3, layer_channels[1]), jnp.float32),
            0.1 * jax.random.normal(k_b3, (3, layer_channels[2]), jnp.float32),
        ],
        # CoordConv 1x1: (concat_dim + 2 coord channels) -> target_dim
        "desc_w": 0.05 * jax.random.normal(k_w, (concat_dim + 2, target_dim), jnp.float32),
        "desc_b": 0.01 * jax.random.normal(k_b, (1, target_dim), jnp.float32),
        # memory_bank as produced by initialize_centroid: (C, num_memory_items)
        "memory_bank": 0.1 * jax.random.normal(k_m, (target_dim, n_memory), jnp.float32),
    }

    distance = adfa_forward(x, params, training=True)            # (B, HW, K)
    amap = adfa_forward(x, params, training=False)               # (B, 1, H, W)
    jax.block_until_ready(distance)
    jax.block_until_ready(amap)

    assert distance.shape == (B, feat_h * feat_w, n_memory)
    assert amap.shape == (B, 1, H, W)
    assert bool(jnp.all(jnp.isfinite(distance)))
    assert bool(jnp.all(jnp.isfinite(amap)))
    print("KERNEL_OK")
</pallas_src>

<mosaic_0001>
module attributes {stable_mosaic.version = 11 : i64} {
  func.func @_normalize_kernel(%arg0: i32, %arg1: memref<6x1024xf32, #tpu.memory_space<vmem>>, %arg2: memref<6x1xf32, #tpu.memory_space<vmem>>, %arg3: memref<6x1xf32, #tpu.memory_space<vmem>>, %arg4: memref<6x1024xf32, #tpu.memory_space<vmem>>) attributes {dimension_semantics = [#tpu.dimension_semantics<parallel>], iteration_bounds = array<i64: 1>, scalar_prefetch = 0 : i64, scratch_operands = 0 : i64, tpu.core_type = #tpu.core_type<tc>, window_params = [{transform_indices = @transform_0, window_bounds = array<i64: 6, 1024>}, {pipeline_mode = #tpu.pipeline_mode<synchronous>, transform_indices = @transform_1, window_bounds = array<i64: 6, 1>}, {pipeline_mode = #tpu.pipeline_mode<synchronous>, transform_indices = @transform_2, window_bounds = array<i64: 6, 1>}, {transform_indices = @transform_3, window_bounds = array<i64: 6, 1024>}]} {
    %c0 = arith.constant 0 : index
    %c0_0 = arith.constant 0 : index
    %0 = vector.load %arg1[%c0, %c0_0] : memref<6x1024xf32, #tpu.memory_space<vmem>>, vector<6x1024xf32>
    %c0_1 = arith.constant 0 : index
    %c0_2 = arith.constant 0 : index
    %1 = vector.load %arg2[%c0_1, %c0_2] : memref<6x1xf32, #tpu.memory_space<vmem>>, vector<6x1xf32>
    %2 = vector.broadcast %1 : vector<6x1xf32> to vector<6x1024xf32>
    %3 = arith.subf %0, %2 : vector<6x1024xf32>
    %c0_3 = arith.constant 0 : index
    %c0_4 = arith.constant 0 : index
    %4 = vector.load %arg3[%c0_3, %c0_4] : memref<6x1xf32, #tpu.memory_space<vmem>>, vector<6x1xf32>
    %5 = vector.broadcast %4 : vector<6x1xf32> to vector<6x1024xf32>
    %6 = arith.mulf %3, %5 : vector<6x1024xf32>
    %c0_5 = arith.constant 0 : index
    %c0_6 = arith.constant 0 : index
    %7 = vector.load %arg4[%c0_5, %c0_6] : memref<6x1024xf32, #tpu.memory_space<vmem>>, vector<6x1024xf32>
    tpu.vector_store %arg4[%c0_5, %c0_6], %6 {strides = array<i32>} : memref<6x1024xf32, #tpu.memory_space<vmem>>, vector<6x1024xf32>,
    return
  }
  func.func @transform_0(%arg0: i32) -> (i32, i32) {
    %c0_i32 = arith.constant 0 : i32
    %c0_i32_0 = arith.constant 0 : i32
    return %c0_i32, %arg0 : i32, i32
  }
  func.func @transform_1(%arg0: i32) -> (i32, i32) {
    %c0_i32 = arith.constant 0 : i32
    %c0_i32_0 = arith.constant 0 : i32
    %c0_i32_1 = arith.constant 0 : i32
    return %c0_i32, %c0_i32_0 : i32, i32
  }
  func.func @transform_2(%arg0: i32) -> (i32, i32) {
    %c0_i32 = arith.constant 0 : i32
    %c0_i32_0 = arith.constant 0 : i32
    %c0_i32_1 = arith.constant 0 : i32
    return %c0_i32, %c0_i32_0 : i32, i32
  }
  func.func @transform_3(%arg0: i32) -> (i32, i32) {
    %c0_i32 = arith.constant 0 : i32
    %c0_i32_0 = arith.constant 0 : i32
    return %c0_i32, %arg0 : i32, i32
  }
}

module attributes {stable_mosaic.version = 11 : i64} {
  func.func @_descriptor_distance_kernel(%arg0: i32, %arg1: memref<128x512xbf16, #tpu.memory_space<vmem>>, %arg2: memref<512x128xbf16, #tpu.memory_space<vmem>>, %arg3: memref<1x128xf32, #tpu.memory_space<vmem>>, %arg4: memref<128x128xbf16, #tpu.memory_space<vmem>>, %arg5: memref<1x128xf32, #tpu.memory_space<vmem>>, %arg6: memref<128x128xf32, #tpu.memory_space<vmem>>) attributes {dimension_semantics = [#tpu.dimension_semantics<parallel>], iteration_bounds = array<i64: 1>, scalar_prefetch = 0 : i64, scratch_operands = 0 : i64, tpu.core_type = #tpu.core_type<tc>, window_params = [{transform_indices = @transform_0, window_bounds = array<i64: 128, 512>}, {pipeline_mode = #tpu.pipeline_mode<synchronous>, transform_indices = @transform_1, window_bounds = array<i64: 512, 128>}, {pipeline_mode = #tpu.pipeline_mode<synchronous>, transform_indices = @transform_2, window_bounds = array<i64: 1, 128>}, {pipeline_mode = #tpu.pipeline_mode<synchronous>, transform_indices = @transform_3, window_bounds = array<i64: 128, 128>}, {pipeline_mode = #tpu.pipeline_mode<synchronous>, transform_indices = @transform_4, window_bounds = array<i64: 1, 128>}, {transform_indices = @transform_5, window_bounds = array<i64: 128, 128>}]} {
    %c0 = arith.constant 0 : index
    %c0_0 = arith.constant 0 : index
    %0 = vector.load %arg1[%c0, %c0_0] : memref<128x512xbf16, #tpu.memory_space<vmem>>, vector<128x512xbf16>
    %c0_1 = arith.constant 0 : index
    %c0_2 = arith.constant 0 : index
    %1 = vector.load %arg2[%c0_1, %c0_2] : memref<512x128xbf16, #tpu.memory_space<vmem>>, vector<512x128xbf16>
    %cst = arith.constant dense<0.000000e+00> : vector<128x128xf32>
    %2 = tpu.matmul %0, %1, %cst {dimension_numbers = #tpu.dot_dimension_numbers<[1], [0], [0], [1], [0, 0, 1, 1], [], []>} : vector<128x512xbf16>, vector<512x128xbf16>, vector<128x128xf32> -> vector<128x128xf32>
    %c0_3 = arith.constant 0 : index
    %c0_4 = arith.constant 0 : index
    %3 = vector.load %arg3[%c0_3, %c0_4] : memref<1x128xf32, #tpu.memory_space<vmem>>, vector<1x128xf32>
    %4 = vector.broadcast %3 : vector<1x128xf32> to vector<128x128xf32>
    %5 = arith.addf %2, %4 : vector<128x128xf32>
    %6 = arith.mulf %5, %5 : vector<128x128xf32>
    %cst_5 = arith.constant dense<0.000000e+00> : vector<128xf32>
    %7 = vector.multi_reduction <add>, %6, %cst_5 [1] : vector<128x128xf32> to vector<128xf32>
    %8 = vector.shape_cast %7 : vector<128xf32> to vector<128x1xf32>
    %9 = arith.truncf %5 : vector<128x128xf32> to vector<128x128xbf16>
    %c0_6 = arith.constant 0 : index
    %c0_7 = arith.constant 0 : index
    %10 = vector.load %arg4[%c0_6, %c0_7] : memref<128x128xbf16, #tpu.memory_space<vmem>>, vector<128x128xbf16>
    %cst_8 = arith.constant dense<0.000000e+00> : vector<128x128xf32>
    %11 = tpu.matmul %9, %10, %cst_8 {dimension_numbers = #tpu.dot_dimension_numbers<[1], [0], [0], [1], [0, 0, 1, 1], [], []>} : vector<128x128xbf16>, vector<128x128xbf16>, vector<128x128xf32> -> vector<128x128xf32>
    %c0_9 = arith.constant 0 : index
    %c0_10 = arith.constant 0 : index
    %12 = vector.load %arg5[%c0_9, %c0_10] : memref<1x128xf32, #tpu.memory_space<vmem>>, vector<1x128xf32>
    %13 = vector.broadcast %8 : vector<128x1xf32> to vector<128x128xf32>
    %14 = vector.broadcast %12 : vector<1x128xf32> to vector<128x128xf32>
    %15 = arith.addf %13, %14 : vector<128x128xf32>
    %16 = arith.subf %15, %11 : vector<128x128xf32>
    %c0_11 = arith.constant 0 : index
    %c0_12 = arith.constant 0 : index
    %17 = vector.load %arg6[%c0_11, %c0_12] : memref<128x128xf32, #tpu.memory_space<vmem>>, vector<128x128xf32>
    tpu.vector_store %arg6[%c0_11, %c0_12], %16 {strides = array<i32>} : memref<128x128xf32, #tpu.memory_space<vmem>>, vector<128x128xf32>,
    return
  }
  func.func @transform_0(%arg0: i32) -> (i32, i32) {
    %c0_i32 = arith.constant 0 : i32
    %c0_i32_0 = arith.constant 0 : i32
    return %arg0, %c0_i32 : i32, i32
  }
  func.func @transform_1(%arg0: i32) -> (i32, i32) {
    %c0_i32 = arith.constant 0 : i32
    %c0_i32_0 = arith.constant 0 : i32
    %c0_i32_1 = arith.constant 0 : i32
    return %c0_i32, %c0_i32_0 : i32, i32
  }
  func.func @transform_2(%arg0: i32) -> (i32, i32) {
    %c0_i32 = arith.constant 0 : i32
    %c0_i32_0 = arith.constant 0 : i32
    %c0_i32_1 = arith.constant 0 : i32
    return %c0_i32, %c0_i32_0 : i32, i32
  }
  func.func @transform_3(%arg0: i32) -> (i32, i32) {
    %c0_i32 = arith.constant 0 : i32
    %c0_i32_0 = arith.constant 0 : i32
    %c0_i32_1 = arith.constant 0 : i32
    return %c0_i32, %c0_i32_0 : i32, i32
  }
  func.func @transform_4(%arg0: i32) -> (i32, i32) {
    %c0_i32 = arith.constant 0 : i32
    %c0_i32_0 = arith.constant 0 : i32
    %c0_i32_1 = arith.constant 0 : i32
    return %c0_i32, %c0_i32_0 : i32, i32
  }
  func.func @transform_5(%arg0: i32) -> (i32, i32) {
    %c0_i32 = arith.constant 0 : i32
    %c0_i32_0 = arith.constant 0 : i32
    return %arg0, %c0_i32 : i32, i32
  }
}

</mosaic_0001>

<bundles_post_ra>
// kernel: tile.0
= control target key start
LH: loop header
LB: loop body
LE: loop exit
PB: predicated region body
PF: predicated region fallthrough
CT: control target
= control target key end

     0   :  { %vm7_vm0 = vcmask 7168   ;;  %s26_s10 = smov 126   ;;  %s49_s0 = inlined_call_operand.vmem [shape: f32[2,3], index: 0, kind: input, shape index: {}]   ;;  %s50_s1 = inlined_call_operand.vmem [shape: f32[6,1], index: 1, kind: output, shape index: {}]  }
   0x1   :  { %v4_v0 = vld [vmem:[%s49_s0] sm:$0x3]  ;;  %s25_s0 = smov 127  }
   0x2   :  { %5 = vst [vmem:[#allocation0] sm:$0x3] %v4_v0 }
   0x9   :  { %v9_v1 = vld [vmem:[#allocation0] sm:$0x3]  }
   0xa   :  { %v6_v2 = vld [vmem:[#allocation0] sm:$0x3]   ;;  %10 = vrot.lane.b32.xlu0 %v9_v1, %s25_s0 }
   0xb   :  { %8 = vst.msk [vmem:[%s50_s1] ss:$3 sm:$0x3] %vm7_vm0, %v6_v2   ;;  %v15_v3 = vld [vmem:[#allocation0] sm:$0x3]  }
   0xe   :  { %16 = vrot.lane.b32.xlu0 %v15_v3, %s26_s10 }
  0x7c   :  { %v11_v4 = vpop.permute.xlu0 %10  }
  0x7d   :  { %21 = vst.msk [vmem:[%s50_s1 + $0x1] ss:$3 sm:$0x3] %vm7_vm0, %v11_v4  }
  0x80   :  { %v17_v5 = vpop.permute.xlu0 %16  }
  0x81   :  { %22 = vst.msk [vmem:[%s50_s1 + $0x2] ss:$3 sm:$0x3] %vm7_vm0, %v17_v5  }

// kernel: tile.10
= control target key start
LH: loop header
LB: loop body
LE: loop exit
PB: predicated region body
PF: predicated region fallthrough
CT: control target
= control target key end

     0   :  { %s22_s0 = inlined_call_operand.vmem [shape: f32[3], index: 0, kind: input, shape index: {}]   ;;  %s23_s1 = inlined_call_operand.vmem [shape: f32[2,3], index: 1, kind: output, shape index: {}]  }
   0x1   :  { %v4_v0 = vld [vmem:[%s22_s0] ss:$0 sm:$0xff] }
   0x2   :  { %5 = vst [vmem:[%s23_s1] sm:$0x3] %v4_v0 }

// kernel: adfa_forward.2
= control target key start
LH: loop header
LB: loop body
LE: loop exit
PB: predicated region body
PF: predicated region fallthrough
CT: control target
= control target key end

     0   :  { %v64_v0 = vmov 0   ;;  %s139_s1 = inlined_call_operand.vmem [shape: f32[6,1], index: 1, kind: input, shape index: {}]   ;;  %s140_s2 = inlined_call_operand.vmem [shape: f32[6,1], index: 2, kind: input, shape index: {}]   ;;  %s141_s0 = inlined_call_operand.vmem [shape: f32[6,1024], index: 0, kind: input, shape index: {}]   ;;  %s142_s3 = inlined_call_operand.vmem [shape: f32[6,1024], index: 3, kind: output, shape index: {}]  }
   0x1   :  { %63 = vset.pattern.permute.xlu0 %v64_v0  ;;  %v22_v1 = vld [vmem:[%s139_s1] sm:$0x3f]  ;;  %v15_v4 = vld [vmem:[%s141_s0 + $0x8] sm:$0x3f]  ;;  %v16_v6 = vld [vmem:[%s141_s0 + $0x10] sm:$0x3f] }
   0x2   :  { %25 = vperm.xlu0 %63, %v22_v1   ;;  %v36_v2 = vld [vmem:[%s140_s2] sm:$0x3f]  ;;  %v17_v7 = vld [vmem:[%s141_s0 + $0x18] sm:$0x3f]  ;;  %v19_v9 = vld [vmem:[%s141_s0 + $0x28] sm:$0x3f] }
   0x3   :  { %v14_v3 = vld [vmem:[%s141_s0] sm:$0x3f]  ;;  %v20_v10 = vld [vmem:[%s141_s0 + $0x30] sm:$0x3f]  ;;  %v21_v11 = vld [vmem:[%s141_s0 + $0x38] sm:$0x3f] }
   0x4   :  { %v18_v8 = vld [vmem:[%s141_s0 + $0x20] sm:$0x3f] }
   0x6   :  { %39 = vperm.xlu0 %63, %v36_v2  }
  0x81   :  { %v26_v5 = vpop.permute.xlu0 %25 }
  0x82   :  { %v28_v12 = vsub.f32 %v14_v3, %v26_v5  ;;  %v29_v13 = vsub.f32 %v15_v4, %v26_v5  ;;  %v30_v14 = vsub.f32 %v16_v6, %v26_v5  ;;  %v31_v15 = vsub.f32 %v17_v7, %v26_v5 }
  0x83   :  { %v32_v17 = vsub.f32 %v18_v8, %v26_v5  ;;  %v33_v18 = vsub.f32 %v19_v9, %v26_v5  ;;  %v34_v19 = vsub.f32 %v20_v10, %v26_v5  ;;  %v35_v20 = vsub.f32 %v21_v11, %v26_v5 }
  0x85   :  { %v40_v16 = vpop.permute.xlu0 %39 }
  0x86   :  { %v42_v21 = vmul.f32 %v40_v16, %v28_v12  ;;  %v43_v22 = vmul.f32 %v40_v16, %v29_v13  ;;  %v44_v23 = vmul.f32 %v40_v16, %v30_v14  ;;  %v45_v24 = vmul.f32 %v40_v16, %v31_v15 }
  0x87   :  { %v46_v25 = vmul.f32 %v40_v16, %v32_v17  ;;  %v47_v26 = vmul.f32 %v40_v16, %v33_v18  ;;  %v48_v27 = vmul.f32 %v40_v16, %v34_v19  ;;  %v49_v28 = vmul.f32 %v40_v16, %v35_v20 }
  0x88   :  { %50 = vst [vmem:[%s142_s3] sm:$0x3f] %v42_v21  ;;  %51 = vst [vmem:[%s142_s3 + $0x8] sm:$0x3f] %v43_v22 }
  0x89   :  { %52 = vst [vmem:[%s142_s3 + $0x10] sm:$0x3f] %v44_v23  ;;  %53 = vst [vmem:[%s142_s3 + $0x18] sm:$0x3f] %v45_v24 }
  0x8a   :  { %54 = vst [vmem:[%s142_s3 + $0x20] sm:$0x3f] %v46_v25  ;;  %55 = vst [vmem:[%s142_s3 + $0x28] sm:$0x3f] %v47_v26 }
  0x8b   :  { %56 = vst [vmem:[%s142_s3 + $0x30] sm:$0x3f] %v48_v27  ;;  %57 = vst [vmem:[%s142_s3 + $0x38] sm:$0x3f] %v49_v28 }

// kernel: adfa_forward.3
= control target key start
LH: loop header
LB: loop body
LE: loop exit
PB: predicated region body
PF: predicated region fallthrough
CT: control target
= control target key end

     0   :  { %s1643_s0 = inlined_call_operand.vmem [shape: bf16[128,512], index: 0, kind: input, shape index: {}]   ;;  %s1644_s1 = inlined_call_operand.vmem [shape: bf16[512,128], index: 1, kind: input, shape index: {}]   ;;  %s1645_s2 = inlined_call_operand.vmem [shape: f32[1,128], index: 2, kind: input, shape index: {}]   ;;  %s1646_s3 = inlined_call_operand.vmem [shape: bf16[128,128], index: 3, kind: input, shape index: {}]   ;;  %s1647_s4 = inlined_call_operand.vmem [shape: f32[1,128], index: 4, kind: input, shape index: {}]   ;;  %s1648_s5 = inlined_call_operand.hbm [shape: f32[128,128], index: 5, kind: output, shape index: {}]  }
   0x1   :  { %v1228_v0 = vld [vmem:[%s1644_s1 + $0x40] sm:$0xff]   ;;  %v1232_v4 = vld [vmem:[%s1644_s1 + $0x48] sm:$0xff]   ;;  %v1236_v8 = vld [vmem:[%s1644_s1 + $0x50] sm:$0xff]  }
   0x2   :  { %v1229_v1 = vld [vmem:[%s1644_s1 + $0xc0] sm:$0xff]   ;;  %1033 = vmatprep.subr.bf16.mxu0 %v1228_v0  ;;  %v1233_v5 = vld [vmem:[%s1644_s1 + $0xc8] sm:$0xff]   ;;  %v1237_v9 = vld [vmem:[%s1644_s1 + $0xd0] sm:$0xff]  }
   0x3   :  { %v1230_v2 = vld [vmem:[%s1644_s1] sm:$0xff]   ;;  %1097 = vmatprep.subr.bf16.mxu1 %v1229_v1  ;;  %v1234_v6 = vld [vmem:[%s1644_s1 + $0x8] sm:$0xff]   ;;  %v1238_v10 = vld [vmem:[%s1644_s1 + $0x10] sm:$0xff]  }
   0x4   :  { %v1231_v3 = vld [vmem:[%s1644_s1 + $0x80] sm:$0xff]   ;;  %1034 = vmatpush3.bf16.msra.mxu0 %v1230_v2  ;;  %v1235_v7 = vld [vmem:[%s1644_s1 + $0x88] sm:$0xff]   ;;  %v1239_v11 = vld [vmem:[%s1644_s1 + $0x90] sm:$0xff]  }
   0x5   :  { %1098 = vmatpush3.bf16.msra.mxu1 %v1231_v3  ;;  %1035 = vmatprep.subr.bf16.mxu0 %v1232_v4  ;;  %v1240_v12 = vld [vmem:[%s1644_s1 + $0x58] sm:$0xff]   ;;  %v1244_v16 = vld [vmem:[%s1644_s1 + $0x60] sm:$0xff]   ;;  %v1248_v20 = vld [vmem:[%s1644_s1 + $0x68] sm:$0xff]  }
   0x6   :  { %1099 = vmatprep.subr.bf16.mxu1 %v1233_v5  ;;  %v1241_v13 = vld [vmem:[%s1644_s1 + $0xd8] sm:$0xff]   ;;  %v1245_v17 = vld [vmem:[%s1644_s1 + $0xe0] sm:$0xff]   ;;  %v1249_v21 = vld [vmem:[%s1644_s1 + $0xe8] sm:$0xff]  }
   0x7   :  { %v1242_v14 = vld [vmem:[%s1644_s1 + $0x18] sm:$0xff]   ;;  %v1246_v18 = vld [vmem:[%s1644_s1 + $0x20] sm:$0xff]   ;;  %v1250_v22 = vld [vmem:[%s1644_s1 + $0x28] sm:$0xff]  }
   0x8   :  { %1036 = vmatpush3.bf16.msra.mxu0 %v1234_v6  ;;  %v1243_v15 = vld [vmem:[%s1644_s1 + $0x98] sm:$0xff]   ;;  %v1247_v19 = vld [vmem:[%s1644_s1 + $0xa0] sm:$0xff]   ;;  %v1251_v23 = vld [vmem:[%s1644_s1 + $0xa8] sm:$0xff]  }
   0x9   :  { %1100 = vmatpush3.bf16.msra.mxu1 %v1235_v7  ;;  %1037 = vmatprep.subr.bf16.mxu0 %v1236_v8  ;;  %v1252_v24 = vld [vmem:[%s1644_s1 + $0x70] sm:$0xff]   ;;  %v1256_v28 = vld [vmem:[%s1644_s1 + $0x78] sm:$0xff]   ;;  %v1308_v47 = vld [vmem:[%s1646_s3] sm:$0xff]  }
   0xa   :  { %1101 = vmatprep.subr.bf16.mxu1 %v1237_v9  ;;  %v1253_v25 = vld [vmem:[%s1644_s1 + $0xf0] sm:$0xff]   ;;  %v1257_v29 = vld [vmem:[%s1644_s1 + $0xf8] sm:$0xff]   ;;  %v1309_v50 = vld [vmem:[%s1646_s3 + $0x8] sm:$0xff]  }
   0xb   :  { %v1254_v26 = vld [vmem:[%s1644_s1 + $0x30] sm:$0xff]   ;;  %v1258_v30 = vld [vmem:[%s1644_s1 + $0x38] sm:$0xff]  }
   0xc   :  { %1038 = vmatpush3.bf16.msra.mxu0 %v1238_v10  ;;  %v1255_v27 = vld [vmem:[%s1644_s1 + $0xb0] sm:$0xff]   ;;  %v1259_v31 = vld [vmem:[%s1644_s1 + $0xb8] sm:$0xff]  }
   0xd   :  { %1102 = vmatpush3.bf16.msra.mxu1 %v1239_v11  ;;  %1039 = vmatprep.subr.bf16.mxu0 %v1240_v12  ;;  %v1260_v32 = vld [vmem:[%s1643_s0] ss:$16 sps:$4 sm:$0xff]   ;;  %v1262_v33 = vld [vmem:[%s1643_s0 + $0x4] ss:$16 sps:$4 sm:$0xff]   ;;  %v1263_v34 = vld [vmem:[%s1643_s0 + $0x8] ss:$16 sps:$4 sm:$0xff]  }
   0xe   :  { %1103 = vmatprep.subr.bf16.mxu1 %v1241_v13  ;;  %v1265_v35 = vld [vmem:[%s1643_s0 + $0xc] ss:$16 sps:$4 sm:$0xff]   ;;  %509 = vmatprep.mubr.bf16.mxu0 %v1262_v33  ;;  %v1266_v36 = vld [vmem:[%s1643_s0 + $0x24] ss:$16 sps:$4 sm:$0xff]   ;;  %v1270_v38 = vld [vmem:[%s1643_s0 + $0x20] ss:$16 sps:$4 sm:$0xff]  }
   0xf   :  { %606 = vmatprep.mubr.bf16.mxu1 %v1265_v35  ;;  %v1268_v37 = vld [vmem:[%s1643_s0 + $0x2c] ss:$16 sps:$4 sm:$0xff]   ;;  %v1271_v39 = vld [vmem:[%s1643_s0 + $0x28] ss:$16 sps:$4 sm:$0xff]   ;;  %v1272_v40 = vld [vmem:[%s1643_s0 + $0x44] ss:$16 sps:$4 sm:$0xff]  }
  0x10   :  { %1040 = vmatpush3.bf16.msra.mxu0 %v1242_v14  ;;  %v1274_v41 = vld [vmem:[%s1643_s0 + $0x4c] ss:$16 sps:$4 sm:$0xff]   ;;  %v1276_v42 = vld [vmem:[%s1643_s0 + $0x40] ss:$16 sps:$4 sm:$0xff]   ;;  %v1277_v43 = vld [vmem:[%s1643_s0 + $0x48] ss:$16 sps:$4 sm:$0xff]  }
  0x11   :  { %1104 = vmatpush3.bf16.msra.mxu1 %v1243_v15  ;;  %1041 = vmatprep.subr.bf16.mxu0 %v1244_v16  ;;  %v1278_v44 = vld [vmem:[%s1643_s0 + $0x64] ss:$16 sps:$4 sm:$0xff]   ;;  %v1280_v45 = vld [vmem:[%s1643_s0 + $0x6c] ss:$16 sps:$4 sm:$0xff]   ;;  %v1282_v46 = vld [vmem:[%s1643_s0 + $0x60] ss:$16 sps:$4 sm:$0xff]  }
  0x12   :  { %1105 = vmatprep.subr.bf16.mxu1 %v1245_v17  ;;  %v1283_v48 = vld [vmem:[%s1643_s0 + $0x68] ss:$16 sps:$4 sm:$0xff]   ;;  %v1284_v49 = vld [vmem:[%s1643_s0 + $0x84] ss:$16 sps:$4 sm:$0xff]   ;;  %v1286_v51 = vld [vmem:[%s1643_s0 + $0x8c] ss:$16 sps:$4 sm:$0xff]  }
  0x13   :  { %v1310_v52 = vld [vmem:[%s1646_s3 + $0x10] sm:$0xff]  }
  0x14   :  { %1042 = vmatpush3.bf16.msra.mxu0 %v1246_v18 }
  0x15   :  { %1106 = vmatpush3.bf16.msra.mxu1 %v1247_v19  ;;  %1043 = vmatprep.subr.bf16.mxu0 %v1248_v20 }
  0x16   :  { %1107 = vmatprep.subr.bf16.mxu1 %v1249_v21 }
  0x18   :  { %1044 = vmatpush3.bf16.msra.mxu0 %v1250_v22 }
  0x19   :  { %1108 = vmatpush3.bf16.msra.mxu1 %v1251_v23  ;;  %1045 = vmatprep.subr.bf16.mxu0 %v1252_v24 }
  0x1a   :  { %1109 = vmatprep.subr.bf16.mxu1 %v1253_v25 }
  0x1c   :  { %1046 = vmatpush3.bf16.msra.mxu0 %v1254_v26 }
  0x1d   :  { %1110 = vmatpush3.bf16.msra.mxu1 %v1255_v27  ;;  %1047 = vmatprep.subr.bf16.mxu0 %v1256_v28 }
  0x1e   :  { %1111 = vmatprep.subr.bf16.mxu1 %v1257_v29 }
  0x20   :  { %1048 = vmatpush3.bf16.msra.mxu0 %v1258_v30 }
  0x21   :  { %1112 = vmatpush3.bf16.msra.mxu1 %v1259_v31  ;;  %1177 = vmatprep.subr.bf16.mxu0 %v1308_v47 }
  0x22   :  { %1209 = vmatprep.subr.bf16.mxu1 %v1308_v47 }
  0x23   :  { %510 = vmatmul.mubr.bf16.vlgmr.msra.gmra.mrb[0].mxu0 %v1260_v32 }
  0x24   :  { %607 = vmatmul.mubr.bf16.vlgmr.msra.gmra.mrb[0].mxu1 %v1263_v34  ;;  %517 = vmatprep.mubr.bf16.mxu0 %v1266_v36 }
  0x25   :  { %614 = vmatprep.mubr.bf16.mxu1 %v1268_v37  ;;  %1178 = vmatpush3.bf16.msra.mxu0 %v1308_v47 }
  0x26   :  { %1217 = vmatpush3.bf16.msra.mxu1 %v1308_v47  ;;  %1179 = vmatprep.subr.bf16.mxu0 %v1309_v50 }
  0x27   :  { %1210 = vmatprep.subr.bf16.mxu1 %v1309_v50 }
  0x2b   :  { %518 = vmatmul.mubr.bf16.gmra.mrb[4].mxu0 %v1270_v38 }
  0x2c   :  { %615 = vmatmul.mubr.bf16.gmra.mrb[4].mxu1 %v1271_v39  ;;  %525 = vmatprep.mubr.bf16.mxu0 %v1272_v40 }
  0x2d   :  { %622 = vmatprep.mubr.bf16.mxu1 %v1274_v41 }
  0x33   :  { %526 = vmatmul.mubr.bf16.gmra.mrb[8].mxu0 %v1276_v42 }
  0x34   :  { %623 = vmatmul.mubr.bf16.gmra.mrb[8].mxu1 %v1277_v43  ;;  %533 = vmatprep.mubr.bf16.mxu0 %v1278_v44 }
  0x35   :  { %630 = vmatprep.mubr.bf16.mxu1 %v1280_v45 }
  0x36   :  { %10 = vsyncpa [#allocation3], 0  ;;  %1180 = vmatpush3.bf16.msra.mxu0 %v1309_v50  ;;  %1218 = vmatpush3.bf16.msra.mxu1 %v1309_v50  ;;  %v1288_v53 = vld [vmem:[%s1643_s0 + $0x80] ss:$16 sps:$4 sm:$0xff]   ;;  %v1289_v54 = vld [vmem:[%s1643_s0 + $0x88] ss:$16 sps:$4 sm:$0xff]  }
  0x37   :  { %1181 = vmatprep.subr.bf16.mxu0 %v1310_v52  ;;  %1211 = vmatprep.subr.bf16.mxu1 %v1310_v52  ;;  %v1290_v55 = vld [vmem:[%s1643_s0 + $0xa4] ss:$16 sps:$4 sm:$0xff]   ;;  %v1292_v56 = vld [vmem:[%s1643_s0 + $0xac] ss:$16 sps:$4 sm:$0xff]   ;;  %v1294_v57 = vld [vmem:[%s1643_s0 + $0xa0] ss:$16 sps:$4 sm:$0xff]  }
  0x38   :  { %v1295_v58 = vld [vmem:[%s1643_s0 + $0xa8] ss:$16 sps:$4 sm:$0xff]   ;;  %v1296_v59 = vld [vmem:[%s1643_s0 + $0xc4] ss:$16 sps:$4 sm:$0xff]   ;;  %v1298_v60 = vld [vmem:[%s1643_s0 + $0xcc] ss:$16 sps:$4 sm:$0xff]  }
  0x39   :  { %v1300_v61 = vld [vmem:[%s1643_s0 + $0xc0] ss:$16 sps:$4 sm:$0xff]   ;;  %v1301_v62 = vld [vmem:[%s1643_s0 + $0xc8] ss:$16 sps:$4 sm:$0xff]   ;;  %v1302_v63 = vld [vmem:[%s1643_s0 + $0xe4] ss:$16 sps:$4 sm:$0xff]  }
  0x3a   :  { %1182 = vmatpush3.bf16.msra.mxu0 %v1310_v52  ;;  %1219 = vmatpush3.bf16.msra.mxu1 %v1310_v52  ;;  %v1304_v0 = vld [vmem:[%s1643_s0 + $0xec] ss:$16 sps:$4 sm:$0xff]   ;;  %v1306_v1 = vld [vmem:[%s1643_s0 + $0xe0] ss:$16 sps:$4 sm:$0xff]   ;;  %v1307_v2 = vld [vmem:[%s1643_s0 + $0xe8] ss:$16 sps:$4 sm:$0xff]  }
  0x3b   :  { %534 = vmatmul.mubr.bf16.gmra.mrb[12].mxu0 %v1282_v46  ;;  %v1311_v3 = vld [vmem:[%s1646_s3 + $0x18] sm:$0xff]   ;;  %v1312_v4 = vld [vmem:[%s1646_s3 + $0x20] sm:$0xff]   ;;  %v1313_v5 = vld [vmem:[%s1646_s3 + $0x28] sm:$0xff]  }
  0x3c   :  { %631 = vmatmul.mubr.bf16.gmra.mrb[12].mxu1 %v1283_v48  ;;  %541 = vmatprep.mubr.bf16.mxu0 %v1284_v49  ;;  %v1314_v6 = vld [vmem:[%s1646_s3 + $0x30] sm:$0xff]   ;;  %v1315_v7 = vld [vmem:[%s1646_s3 + $0x38] sm:$0xff]   ;;  %v1592_v10 = vld [vmem:[%s1645_s2] ss:$0 sm:$0xff] }
  0x3d   :  { %638 = vmatprep.mubr.bf16.mxu1 %v1286_v51  ;;  %1183 = vmatprep.subr.bf16.mxu0 %v1311_v3 }
  0x3e   :  { %1212 = vmatprep.subr.bf16.mxu1 %v1311_v3  ;;  %1184 = vmatpush3.bf16.msra.mxu0 %v1311_v3 }
  0x3f   :  { %1220 = vmatpush3.bf16.msra.mxu1 %v1311_v3  ;;  %1185 = vmatprep.subr.bf16.mxu0 %v1312_v4 }
  0x40   :  { %1213 = vmatprep.subr.bf16.mxu1 %v1312_v4 }
  0x42   :  { %1186 = vmatpush3.bf16.msra.mxu0 %v1312_v4 }
  0x43   :  { %542 = vmatmul.mubr.bf16.gmra.mrb[16].mxu0 %v1288_v53  ;;  %1221 = vmatpush3.bf16.msra.mxu1 %v1312_v4 }
  0x44   :  { %639 = vmatmul.mubr.bf16.gmra.mrb[16].mxu1 %v1289_v54  ;;  %549 = vmatprep.mubr.bf16.mxu0 %v1290_v55 }
  0x45   :  { %646 = vmatprep.mubr.bf16.mxu1 %v1292_v56  ;;  %1187 = vmatprep.subr.bf16.mxu0 %v1313_v5 }
  0x46   :  { %1214 = vmatprep.subr.bf16.mxu1 %v1313_v5  ;;  %1188 = vmatpush3.bf16.msra.mxu0 %v1313_v5 }
  0x47   :  { %1222 = vmatpush3.bf16.msra.mxu1 %v1313_v5  ;;  %1189 = vmatprep.subr.bf16.mxu0 %v1314_v6 }
  0x48   :  { %1215 = vmatprep.subr.bf16.mxu1 %v1314_v6 }
  0x4a   :  { %1190 = vmatpush3.bf16.msra.mxu0 %v1314_v6 }
  0x4b   :  { %550 = vmatmul.mubr.bf16.gmra.mrb[20].mxu0 %v1294_v57  ;;  %1223 = vmatpush3.bf16.msra.mxu1 %v1314_v6 }
  0x4c   :  { %647 = vmatmul.mubr.bf16.gmra.mrb[20].mxu1 %v1295_v58  ;;  %557 = vmatprep.mubr.bf16.mxu0 %v1296_v59 }
  0x4d   :  { %654 = vmatprep.mubr.bf16.mxu1 %v1298_v60  ;;  %1191 = vmatprep.subr.bf16.mxu0 %v1315_v7 }
  0x4e   :  { %1216 = vmatprep.subr.bf16.mxu1 %v1315_v7  ;;  %1192 = vmatpush3.bf16.msra.mxu0 %v1315_v7 }
  0x4f   :  { %1224 = vmatpush3.bf16.msra.mxu1 %v1315_v7 }
  0x53   :  { %558 = vmatmul.mubr.bf16.gmra.mrb[24].mxu0 %v1300_v61 }
  0x54   :  { %655 = vmatmul.mubr.bf16.gmra.mrb[24].mxu1 %v1301_v62  ;;  %565 = vmatprep.mubr.bf16.mxu0 %v1302_v63 }
  0x55   :  { %662 = vmatprep.mubr.bf16.mxu1 %v1304_v0 }
  0x5b   :  { %566 = vmatmul.mubr.bf16.gmra.mrb[28].mxu0 %v1306_v1 }
  0x5c   :  { %663 = vmatmul.mubr.bf16.gmra.mrb[28].mxu1 %v1307_v2 }
  0xf6   :  { %v1049_v8 = vpop.f32.mrb[0].mxu0 }
  0xf7   :  { %v1113_v9 = vpop.f32.mrb[0].mxu1  ;;  %v1050_v11 = vpop.f32.mrb[1].mxu0 }
  0xf8   :  { %v1051_v12 = vadd.f32 %v1050_v11, %v1049_v8  ;;  %v1114_v13 = vpop.f32.mrb[1].mxu1  ;;  %v1052_v14 = vpop.f32.mrb[2].mxu0 }
  0xf9   :  { %v1115_v15 = vadd.f32 %v1114_v13, %v1113_v9  ;;  %v1116_v16 = vpop.f32.mrb[2].mxu1  ;;  %v1053_v17 = vpop.f32.mrb[3].mxu0 }
  0xfa   :  { %v512_v18 = vadd.f32 %v1051_v12, %v1592_v10  ;;  %v1054_v19 = vadd.f32 %v1053_v17, %v1052_v14  ;;  %v1117_v20 = vpop.f32.mrb[3].mxu1 }
  0xfb   :  { %v1118_v21 = vadd.f32 %v1117_v20, %v1116_v16 }
  0xfc   :  { %v515_v22 = vadd.f32 %v1054_v19, %v1592_v10  ;;  %v609_v23 = vadd.f32 %v1115_v15, %v512_v18 }
  0xfe   :  { %v612_v24 = vadd.f32 %v1118_v21, %v515_v22  ;;  %v1055_v25 = vpop.f32.mrb[4].mxu0  ;;  %v671_v26 = vmul.f32 %v609_v23, %v609_v23 }
  0xff   :  { %v1119_v27 = vpop.f32.mrb[4].mxu1  ;;  %v1056_v28 = vpop.f32.mrb[5].mxu0 }
 0x100   :  { %v1057_v29 = vadd.f32 %v1056_v28, %v1055_v25  ;;  %v1120_v30 = vpop.f32.mrb[5].mxu1  ;;  %v1058_v31 = vpop.f32.mrb[6].mxu0  ;;  %687 = vadd.xlane.f32.xlu0 %v671_v26  ;;  %v719_v32 = vpack.c.bf16 %v612_v24, %v609_v23  ;;  %v672_v39 = vmul.f32 %v612_v24, %v612_v24 }
 0x101   :  { %v1121_v33 = vadd.f32 %v1120_v30, %v1119_v27  ;;  %v1122_v34 = vpop.f32.mrb[6].mxu1  ;;  %v1059_v35 = vpop.f32.mrb[7].mxu0 }
 0x102   :  { %v520_v36 = vadd.f32 %v1057_v29, %v1592_v10  ;;  %v1060_v37 = vadd.f32 %v1059_v35, %v1058_v31  ;;  %v1123_v38 = vpop.f32.mrb[7].mxu1  ;;  %1193 = vmatprep.mubr.bf16.mxu0 %v719_v32 }
 0x103   :  { %v1124_v40 = vadd.f32 %v1123_v38, %v1122_v34 }
 0x104   :  { %v523_v41 = vadd.f32 %v1060_v37, %v1592_v10  ;;  %689 = vadd.xlane.f32.xlu0 %v672_v39  ;;  %v617_v42 = vadd.f32 %v1121_v33, %v520_v36 }
 0x106   :  { %v620_v43 = vadd.f32 %v1124_v40, %v523_v41  ;;  %v1061_v44 = vpop.f32.mrb[8].mxu0  ;;  %v673_v45 = vmul.f32 %v617_v42, %v617_v42 }
 0x107   :  { %v1125_v46 = vpop.f32.mrb[8].mxu1  ;;  %v1062_v47 = vpop.f32.mrb[9].mxu0 }
 0x108   :  { %v1063_v48 = vadd.f32 %v1062_v47, %v1061_v44  ;;  %v1126_v49 = vpop.f32.mrb[9].mxu1  ;;  %v1064_v50 = vpop.f32.mrb[10].mxu0  ;;  %v720_v51 = vpack.c.bf16 %v620_v43, %v617_v42  ;;  %691 = vadd.xlane.f32.xlu1 %v673_v45  ;;  %v674_v58 = vmul.f32 %v620_v43, %v620_v43 }
 0x109   :  { %v1127_v52 = vadd.f32 %v1126_v49, %v1125_v46  ;;  %v1128_v53 = vpop.f32.mrb[10].mxu1  ;;  %v1065_v54 = vpop.f32.mrb[11].mxu0 }
 0x10a   :  { %v528_v55 = vadd.f32 %v1063_v48, %v1592_v10  ;;  %v1066_v56 = vadd.f32 %v1065_v54, %v1064_v50  ;;  %v1129_v57 = vpop.f32.mrb[11].mxu1  ;;  %1194 = vmatmul.mubr.bf16.vlgmr.msra.gmra.mrb[32].mxu0 %v720_v51 }
 0x10b   :  { %v1130_v59 = vadd.f32 %v1129_v57, %v1128_v53 }
 0x10c   :  { %v625_v60 = vadd.f32 %v1127_v52, %v528_v55  ;;  %v531_v61 = vadd.f32 %v1066_v56, %v1592_v10  ;;  %693 = vadd.xlane.f32.xlu1 %v674_v58 }
 0x10e   :  { %v628_v62 = vadd.f32 %v1130_v59, %v531_v61  ;;  %v1067_v63 = vpop.f32.mrb[12].mxu0  ;;  %v675_v0 = vmul.f32 %v625_v60, %v625_v60 }
 0x10f   :  { %v1131_v1 = vpop.f32.mrb[12].mxu1  ;;  %v1068_v2 = vpop.f32.mrb[13].mxu0 }
 0x110   :  { %v1069_v3 = vadd.f32 %v1068_v2, %v1067_v63  ;;  %v1132_v4 = vpop.f32.mrb[13].mxu1  ;;  %v1070_v5 = vpop.f32.mrb[14].mxu0  ;;  %695 = vadd.xlane.f32.xlu0 %v675_v0  ;;  %v676_v6 = vmul.f32 %v628_v62, %v628_v62  ;;  %v721_v7 = vpack.c.bf16 %v628_v62, %v625_v60 }
 0x111   :  { %v1133_v8 = vadd.f32 %v1132_v4, %v1131_v1  ;;  %v1134_v9 = vpop.f32.mrb[14].mxu1  ;;  %v1071_v11 = vpop.f32.mrb[15].mxu0 }
 0x112   :  { %v536_v12 = vadd.f32 %v1069_v3, %v1592_v10  ;;  %v1072_v13 = vadd.f32 %v1071_v11, %v1070_v5  ;;  %v1135_v14 = vpop.f32.mrb[15].mxu1  ;;  %697 = vadd.xlane.f32.xlu1 %v676_v6  ;;  %1197 = vmatprep.mubr.bf16.mxu0 %v721_v7 }
 0x113   :  { %v1136_v15 = vadd.f32 %v1135_v14, %v1134_v9 }
 0x114   :  { %v633_v16 = vadd.f32 %v1133_v8, %v536_v12  ;;  %v539_v17 = vadd.f32 %v1072_v13, %v1592_v10 }
 0x116   :  { %v636_v18 = vadd.f32 %v1136_v15, %v539_v17  ;;  %v1073_v19 = vpop.f32.mrb[16].mxu0  ;;  %v677_v20 = vmul.f32 %v633_v16, %v633_v16 }
 0x117   :  { %v1137_v21 = vpop.f32.mrb[16].mxu1  ;;  %v1074_v22 = vpop.f32.mrb[17].mxu0 }
 0x118   :  { %v1075_v23 = vadd.f32 %v1074_v22, %v1073_v19  ;;  %v1138_v24 = vpop.f32.mrb[17].mxu1  ;;  %v1076_v25 = vpop.f32.mrb[18].mxu0  ;;  %699 = vadd.xlane.f32.xlu0 %v677_v20  ;;  %v678_v26 = vmul.f32 %v636_v18, %v636_v18  ;;  %v722_v27 = vpack.c.bf16 %v636_v18, %v633_v16 }
 0x119   :  { %v1139_v28 = vadd.f32 %v1138_v24, %v1137_v21  ;;  %v1140_v29 = vpop.f32.mrb[18].mxu1  ;;  %v1077_v30 = vpop.f32.mrb[19].mxu0 }
 0x11a   :  { %v544_v31 = vadd.f32 %v1075_v23, %v1592_v10  ;;  %v1078_v32 = vadd.f32 %v1077_v30, %v1076_v25  ;;  %v1141_v33 = vpop.f32.mrb[19].mxu1  ;;  %701 = vadd.xlane.f32.xlu1 %v678_v26  ;;  %1198 = vmatmul.mubr.bf16.gmra.mrb[36].mxu0 %v722_v27 }
 0x11b   :  { %v1142_v34 = vadd.f32 %v1141_v33, %v1140_v29 }
 0x11c   :  { %v641_v35 = vadd.f32 %v1139_v28, %v544_v31  ;;  %v547_v36 = vadd.f32 %v1078_v32, %v1592_v10 }
 0x11e   :  { %v644_v37 = vadd.f32 %v1142_v34, %v547_v36  ;;  %v1079_v38 = vpop.f32.mrb[20].mxu0  ;;  %v679_v39 = vmul.f32 %v641_v35, %v641_v35 }
 0x11f   :  { %v1143_v40 = vpop.f32.mrb[20].mxu1  ;;  %v1080_v41 = vpop.f32.mrb[21].mxu0 }
 0x120   :  { %v1081_v42 = vadd.f32 %v1080_v41, %v1079_v38  ;;  %v1144_v43 = vpop.f32.mrb[21].mxu1  ;;  %v1082_v44 = vpop.f32.mrb[22].mxu0  ;;  %703 = vadd.xlane.f32.xlu0 %v679_v39  ;;  %v723_v45 = vpack.c.bf16 %v644_v37, %v641_v35  ;;  %v680_v46 = vmul.f32 %v644_v37, %v644_v37  ;;  %v1613_v37 = vld [vmem:[%s1647_s4] ss:$0 sm:$0xff]  ;;  %s1340_s4 = smov [#allocation2]  }
 0x121   :  { %v1145_v47 = vadd.f32 %v1144_v43, %v1143_v40  ;;  %v1146_v48 = vpop.f32.mrb[22].mxu1  ;;  %v1083_v49 = vpop.f32.mrb[23].mxu0  ;;  %s948_s10 = sshll.u32 %s1340_s4, 4  ;;  %s949_s10 = int_to_ptr.vmem [resolvable:$true] %s948_s10 }
 0x122   :  { %v552_v50 = vadd.f32 %v1081_v42, %v1592_v10  ;;  %v1084_v51 = vadd.f32 %v1083_v49, %v1082_v44  ;;  %v1147_v52 = vpop.f32.mrb[23].mxu1  ;;  %1201 = vmatprep.mubr.bf16.mxu1 %v723_v45  ;;  %705 = vadd.xlane.f32.xlu1 %v680_v46  ;;  %s1316_s11 = scalar_lea.vmem %s949_s10, 2048  ;;  %p1321_p1 = scmp.lt.s32.totalorder %s949_s10, %s949_s10 }
 0x123   :  { %v1148_v53 = vadd.f32 %v1147_v52, %v1146_v48  ;;  %p1317_p0 = scmp.ne.s32.totalorder %s949_s10, %s1316_s11  ;;  %p1322_p2 = scmp.lt.s32.totalorder %s1316_s11, %s1316_s11 }
 0x124   :  { %v649_v54 = vadd.f32 %v1145_v47, %v552_v50  ;;  %v555_v55 = vadd.f32 %v1084_v51, %v1592_v10 }
 0x125   :  { %p1323_p3 = por %p1322_p2, %p1321_p1 }
 0x126   :  { %v652_v56 = vadd.f32 %v1148_v53, %v555_v55  ;;  %v1085_v57 = vpop.f32.mrb[24].mxu0  ;;  %v681_v58 = vmul.f32 %v649_v54, %v649_v54 }
 0x127   :  { %v1149_v59 = vpop.f32.mrb[24].mxu1  ;;  %v1086_v60 = vpop.f32.mrb[25].mxu0  ;;  %p1324_p4 = pnand %p1323_p3, %p1317_p0 }
 0x128   :  { %v724_v61 = vpack.c.bf16 %v652_v56, %v649_v54  ;;  %v1087_v62 = vadd.f32 %v1086_v60, %v1085_v57  ;;  %v1150_v63 = vpop.f32.mrb[25].mxu1  ;;  %v1088_v0 = vpop.f32.mrb[26].mxu0  ;;  %707 = vadd.xlane.f32.xlu0 %v681_v58  ;;  %v682_v1 = vmul.f32 %v652_v56, %v652_v56 }
 0x129   :  { %v1151_v2 = vadd.f32 %v1150_v63, %v1149_v59  ;;  %v1152_v3 = vpop.f32.mrb[26].mxu1  ;;  %v1089_v4 = vpop.f32.mrb[27].mxu0 }
 0x12a   :  { %v560_v5 = vadd.f32 %v1087_v62, %v1592_v10  ;;  %v1090_v6 = vadd.f32 %v1089_v4, %v1088_v0  ;;  %v1153_v7 = vpop.f32.mrb[27].mxu1  ;;  %1202 = vmatmul.mubr.bf16.vlgmr.msra.gmra.mrb[32].mxu1 %v724_v61  ;;  %709 = vadd.xlane.f32.xlu1 %v682_v1 }
 0x12b   :  { %v1154_v8 = vadd.f32 %v1153_v7, %v1152_v3 }
 0x12c   :  { %v657_v9 = vadd.f32 %v1151_v2, %v560_v5  ;;  %v563_v11 = vadd.f32 %v1090_v6, %v1592_v10 }
 0x12e   :  { %v660_v12 = vadd.f32 %v1154_v8, %v563_v11  ;;  %v1091_v13 = vpop.f32.mrb[28].mxu0  ;;  %v683_v14 = vmul.f32 %v657_v9, %v657_v9 }
 0x12f   :  { %v1155_v15 = vpop.f32.mrb[28].mxu1  ;;  %v1092_v16 = vpop.f32.mrb[29].mxu0 }
 0x130   :  { %v1093_v17 = vadd.f32 %v1092_v16, %v1091_v13  ;;  %v1156_v18 = vpop.f32.mrb[29].mxu1  ;;  %v1094_v19 = vpop.f32.mrb[30].mxu0  ;;  %711 = vadd.xlane.f32.xlu0 %v683_v14  ;;  %v725_v20 = vpack.c.bf16 %v660_v12, %v657_v9  ;;  %v684_v21 = vmul.f32 %v660_v12, %v660_v12 }
 0x131   :  { %v1157_v22 = vadd.f32 %v1156_v18, %v1155_v15  ;;  %v1158_v23 = vpop.f32.mrb[30].mxu1  ;;  %v1095_v24 = vpop.f32.mrb[31].mxu0 }
 0x132   :  { %v568_v25 = vadd.f32 %v1093_v17, %v1592_v10  ;;  %v1096_v26 = vadd.f32 %v1095_v24, %v1094_v19  ;;  %v1159_v27 = vpop.f32.mrb[31].mxu1  ;;  %1205 = vmatprep.mubr.bf16.mxu1 %v725_v20  ;;  %713 = vadd.xlane.f32.xlu1 %v684_v21 }
 0x133   :  { %v1160_v28 = vadd.f32 %v1159_v27, %v1158_v23 }
 0x134   :  { %v665_v29 = vadd.f32 %v1157_v22, %v568_v25  ;;  %v571_v30 = vadd.f32 %v1096_v26, %v1592_v10 }
 0x136   :  { %v668_v31 = vadd.f32 %v1160_v28, %v571_v30  ;;  %v685_v32 = vmul.f32 %v665_v29, %v665_v29 }
 0x138   :  { %715 = vadd.xlane.f32.xlu0 %v685_v32  ;;  %v726_v33 = vpack.c.bf16 %v668_v31, %v665_v29  ;;  %v686_v34 = vmul.f32 %v668_v31, %v668_v31 }
 0x13a   :  { %1206 = vmatmul.mubr.bf16.gmra.mrb[36].mxu1 %v726_v33  ;;  %717 = vadd.xlane.f32.xlu1 %v686_v34 }
 0x18d   :  { %v688_v36 = vpop.xlane.xlu0 %687 }
 0x18e   :  { %v895_v10 = vadd.f32 %v1613_v37, %v688_v36 }
 0x191   :  { %v690_v39 = vpop.xlane.xlu0 %689 }
 0x192   :  { %v896_v45 = vadd.f32 %v1613_v37, %v690_v39 }
 0x195   :  { %v692_v35 = vpop.xlane.xlu1 %691 }
 0x196   :  { %v897_v40 = vadd.f32 %v1613_v37, %v692_v35 }
 0x199   :  { %v694_v38 = vpop.xlane.xlu1 %693 }
 0x19a   :  { %v898_v42 = vadd.f32 %v1613_v37, %v694_v38 }
 0x19d   :  { %v696_v51 = vpop.xlane.xlu0 %695 }
 0x19e   :  { %v899_v56 = vadd.f32 %v1613_v37, %v696_v51 }
 0x19f   :  { %v698_v52 = vpop.xlane.xlu1 %697 }
 0x1a0   :  { %v900_v61 = vadd.f32 %v1613_v37, %v698_v52 }
 0x1a5   :  { %v700_v53 = vpop.xlane.xlu0 %699 }
 0x1a6   :  { %v901_v55 = vadd.f32 %v1613_v37, %v700_v53 }
 0x1a7   :  { %v702_v54 = vpop.xlane.xlu1 %701 }
 0x1a8   :  { %v902_v58 = vadd.f32 %v1613_v37, %v702_v54 }
 0x1ad   :  { %v704_v3 = vpop.xlane.xlu0 %703 }
 0x1ae   :  { %v903_v8 = vadd.f32 %v1613_v37, %v704_v3 }
 0x1af   :  { %v706_v4 = vpop.xlane.xlu1 %705 }
 0x1b0   :  { %v904_v14 = vadd.f32 %v1613_v37, %v706_v4 }
 0x1b5   :  { %v708_v5 = vpop.xlane.xlu0 %707 }
 0x1b6   :  { %v905_v7 = vadd.f32 %v1613_v37, %v708_v5 }
 0x1b7   :  { %v710_v6 = vpop.xlane.xlu1 %709 }
 0x1b8   :  { %v906_v11 = vadd.f32 %v1613_v37, %v710_v6 }
 0x1bd   :  { %v712_v20 = vpop.xlane.xlu0 %711 }
 0x1be   :  { %v907_v25 = vadd.f32 %v1613_v37, %v712_v20 }
 0x1bf   :  { %v714_v21 = vpop.xlane.xlu1 %713 }
 0x1c0   :  { %v908_v30 = vadd.f32 %v1613_v37, %v714_v21 }
 0x1c5   :  { %v716_v22 = vpop.xlane.xlu0 %715 }
 0x1c6   :  { %v909_v24 = vadd.f32 %v1613_v37, %v716_v22 }
 0x1c7   :  { %v718_v23 = vpop.xlane.xlu1 %717 }
 0x1c8   :  { %v910_v27 = vadd.f32 %v1613_v37, %v718_v23 }
 0x1dd   :  { %v1195_v41 = vpop.f32.mrb[32].mxu0 }
 0x1de   :  { %v913_v43 = vsub.f32 %v897_v40, %v1195_v41  ;;  %v825_v44 = vpop.f32.mrb[33].mxu0 }
 0x1df   :  { %v911_v46 = vsub.f32 %v895_v10, %v825_v44  ;;  %v1196_v47 = vpop.f32.mrb[34].mxu0 }
 0x1e0   :  { %929 = vst [vmem:[#allocation2 + $0x10] sm:$0xff] %v913_v43  ;;  %v914_v48 = vsub.f32 %v898_v42, %v1196_v47  ;;  %v828_v49 = vpop.f32.mrb[35].mxu0 }
 0x1e1   :  { %927 = vst [vmem:[#allocation2] sm:$0xff] %v911_v46  ;;  %v912_v50 = vsub.f32 %v896_v45, %v828_v49 }
 0x1e2   :  { %930 = vst [vmem:[#allocation2 + $0x18] sm:$0xff] %v914_v48 }
 0x1e3   :  { %928 = vst [vmem:[#allocation2 + $0x8] sm:$0xff] %v912_v50 }
 0x1ed   :  { %v1199_v57 = vpop.f32.mrb[36].mxu0 }
 0x1ee   :  { %v917_v59 = vsub.f32 %v901_v55, %v1199_v57  ;;  %v841_v60 = vpop.f32.mrb[37].mxu0 }
 0x1ef   :  { %v915_v62 = vsub.f32 %v899_v56, %v841_v60  ;;  %v1200_v63 = vpop.f32.mrb[38].mxu0 }
 0x1f0   :  { %933 = vst [vmem:[#allocation2 + $0x30] sm:$0xff] %v917_v59  ;;  %v918_v0 = vsub.f32 %v902_v58, %v1200_v63  ;;  %v844_v1 = vpop.f32.mrb[39].mxu0 }
 0x1f1   :  { %931 = vst [vmem:[#allocation2 + $0x20] sm:$0xff] %v915_v62  ;;  %v916_v2 = vsub.f32 %v900_v61, %v844_v1 }
 0x1f2   :  { %934 = vst [vmem:[#allocation2 + $0x38] sm:$0xff] %v918_v0 }
 0x1f3   :  { %932 = vst [vmem:[#allocation2 + $0x28] sm:$0xff] %v916_v2 }
 0x1fd   :  { %v1203_v9 = vpop.f32.mrb[32].mxu1 }
 0x1fe   :  { %v921_v12 = vsub.f32 %v905_v7, %v1203_v9  ;;  %v857_v13 = vpop.f32.mrb[33].mxu1 }
 0x1ff   :  { %v919_v15 = vsub.f32 %v903_v8, %v857_v13  ;;  %v1204_v16 = vpop.f32.mrb[34].mxu1 }
 0x200   :  { %937 = vst [vmem:[#allocation2 + $0x50] sm:$0xff] %v921_v12  ;;  %v922_v17 = vsub.f32 %v906_v11, %v1204_v16  ;;  %v860_v18 = vpop.f32.mrb[35].mxu1 }
 0x201   :  { %935 = vst [vmem:[#allocation2 + $0x40] sm:$0xff] %v919_v15  ;;  %v920_v19 = vsub.f32 %v904_v14, %v860_v18 }
 0x202   :  { %938 = vst [vmem:[#allocation2 + $0x58] sm:$0xff] %v922_v17 }
 0x203   :  { %936 = vst [vmem:[#allocation2 + $0x48] sm:$0xff] %v920_v19 }
 0x20d   :  { %v1207_v26 = vpop.f32.mrb[36].mxu1 }
 0x20e   :  { %v925_v28 = vsub.f32 %v909_v24, %v1207_v26  ;;  %v873_v29 = vpop.f32.mrb[37].mxu1 }
 0x20f   :  { %v923_v31 = vsub.f32 %v907_v25, %v873_v29  ;;  %v1208_v32 = vpop.f32.mrb[38].mxu1 }
 0x210   :  { %941 = vst [vmem:[#allocation2 + $0x70] sm:$0xff] %v925_v28  ;;  %v926_v33 = vsub.f32 %v910_v27, %v1208_v32  ;;  %v876_v34 = vpop.f32.mrb[39].mxu1 }
 0x211   :  { %939 = vst [vmem:[#allocation2 + $0x60] sm:$0xff] %v923_v31  ;;  %v924_v35 = vsub.f32 %v908_v30, %v876_v34 }
 0x212   :  { %942 = vst [vmem:[#allocation2 + $0x78] sm:$0xff] %v926_v33 }
 0x213   :  { %940 = vst [vmem:[#allocation2 + $0x68] sm:$0xff] %v924_v35 }
 0x214   :  { %1327 = shalt.err (!%p1324_p4)
}
 0x215   :  { %s1328_s14 = scalar_lea.hbm %s1648_s5, 2048 }
 0x216   :  { %p1329_p5 = scmp.ne.s32.totalorder %s1648_s5, %s1328_s14  ;;  %p1332_p6 = scmp.lt.u32.totalorder %s1328_s14, %s1648_s5 }
 0x218   :  { %p1334_p7 = pnand %p1332_p6, %p1329_p5 }
 0x21a   :  { %1337 = shalt.err (!%p1334_p7)
}
 0x21b   :  { %s1341_s18 = smov 128   ;;  %s1342_s19 = smov 8  }
 0x21c   :  { %954 = dma.vmem_to_hbm [thread:$0]  %s949_s10, 2048, %s1648_s5, [#allocation3], %s1341_s18, %s1341_s18, %s1342_s19  }
 0x21d   :  { %1338 = dma.done.wait [#allocation3], 2048  }
 0x21e   :  { %1339 = vsyncadd [#allocation3], 4294965248 }
 0x21f   :  { %958 = vsyncpa [#allocation3], 1 }

</bundles_post_ra>
